<compile_context>
chip_gen: v7x
topology: tpu7x:2x2x1
jax: 0.10.0
libtpu: 0.0.40
codegen_flags: <defaults>
</compile_context>

<pallas_src>
import functools

import jax
import jax.numpy as jnp
from jax import lax
from jax.experimental import pallas as pl
from jax.experimental.pallas import tpu as pltpu


_TARGET_BLOCK_BYTES = 4 * 1024 * 1024   # ~4 MiB per (c_tile, H*W) block
_MAX_CHANNEL_UNROLL = 256               # bound the static per-channel unroll


def _pick_c_tile(N, C, HW, itemsize):
    """Largest channel tile: divisor of C, full-C or multiple of 8 (sublane rule),
    block <= ~4 MiB, bounded unroll; keeps >= 2 grid blocks when possible."""
    def ok(d):
        return ((d == C or d % 8 == 0)
                and d * HW * itemsize <= _TARGET_BLOCK_BYTES
                and d <= _MAX_CHANNEL_UNROLL)
    cands = [d for d in range(1, C + 1) if C % d == 0 and ok(d)]
    if not cands:
        # Degenerate (e.g. huge single channel / prime C): one block of all C.
        return C
    c_tile = max(cands)
    # Keep both v7x TensorCores busy if the batch alone does not give >= 2 blocks.
    if N * (C // c_tile) < 2:
        smaller = [d for d in cands if C // d >= 2]
        if smaller:
            c_tile = max(smaller)
    return c_tile


def _shift_kernel(x_ref, y_ref, *, shifts, c_tile, H, W, n_cblocks):
    """Processes one (c_tile, H*W) slab of one batch element.

    x_ref, y_ref : VMEM (c_tile, H*W), lane-dense
    shifts       : static tuple of (dx, dy) per *global* channel (baked in)
    """
    HW = H * W
    # Flattened position p = h*W + w along the lane axis (2-D iota on TPU).
    pos = lax.broadcasted_iota(jnp.int32, (1, HW), 1)
    # w = p mod W without integer div/mod (no integer divide on the VPU).
    # Exact as long as H*W*2^-23 < 0.5/W, i.e. for any realistic feature map.
    h_f = jnp.floor((pos.astype(jnp.float32) + 0.5) * (1.0 / float(W)))
    w_idx = pos - h_f.astype(jnp.int32) * W

    def emit_chunk(j):
        # Masks are compile-time-constant patterns; cache per distinct (dy, dx)
        # within this chunk (chunks live in separate pl.when branches).
        mask_cache = {}

        def valid_mask(dy, dx):
            key = (dy, dx)
            if key not in mask_cache:
                # h in [dy, H+dy)  <=>  p in [dy*W, (H+dy)*W)   (no division needed)
                m = (pos >= dy * W) & (pos < (H + dy) * W)
                # w in [dx, W+dx): only one side is non-trivial for |dx| < W.
                if dx > 0:
                    m = m & (w_idx >= dx)
                elif dx < 0:
                    m = m & (w_idx < W + dx)
                mask_cache[key] = m
            return mask_cache[key]

        for c in range(c_tile):
            dx, dy = shifts[j * c_tile + c]
            row = x_ref[pl.ds(c, 1), :]                  # (1, H*W), lane-dense
            s = dy * W + dx                              # combined flat shift
            if s != 0:
                # Static roll (wrap-around is zeroed by the mask below).
                row = jnp.roll(row, s, axis=1)
            if dx != 0 or dy != 0:
                row = jnp.where(valid_mask(dy, dx), row, jnp.zeros_like(row))
            y_ref[pl.ds(c, 1), :] = row

    if n_cblocks == 1:
        emit_chunk(0)
    else:
        # Per-channel shifts are static, so select the chunk's code by block id.
        cb = pl.program_id(1)
        for j in range(n_cblocks):
            @pl.when(cb == j)
            def _(j=j):
                emit_chunk(j)


_KERNEL_PROBS = {
    3: (0.3, 0.4, 0.3),
    5: (0.1, 0.25, 0.3, 0.25, 0.1),
    7: (0.075, 0.1, 0.175, 0.3, 0.175, 0.1, 0.075),
    9: (0.05, 0.075, 0.1, 0.175, 0.2, 0.175, 0.1, 0.075, 0.05),
}


class ShiftPallas:
    """Pallas TPU port of the Shift module (forward pass only).

    The kernel is specialized to the shift_t buffer drawn at construction time
    (it is a registered buffer, not a learned parameter): every channel reduces
    to a static roll + constant mask, i.e. a pure streaming copy.
    """

    def __init__(self, in_channels, kernel_size, *, key):
        if kernel_size not in _KERNEL_PROBS:
            raise RuntimeError("Unsupported kernel size")
        self.channels = in_channels
        self.kernel_size = kernel_size
        p = jnp.array(_KERNEL_PROBS[kernel_size], jnp.float32)
        idx = jax.random.choice(key, kernel_size, shape=(in_channels, 2), p=p)
        # buffer shift_t: int32 (C, 2), values in [-k//2, k//2]
        self.shift_t = (idx - kernel_size // 2).astype(jnp.int32)
        # Static per-channel (dx, dy) baked into the kernel.
        self._shifts = tuple((int(dx), int(dy)) for dx, dy in self.shift_t.tolist())

    def __call__(self, x):
        N, C, H, W = x.shape
        assert C == self.channels
        HW = H * W
        itemsize = x.dtype.itemsize
        c_tile = _pick_c_tile(N, C, HW, itemsize)
        n_cblocks = C // c_tile
        block_bytes = c_tile * HW * itemsize

        kernel = functools.partial(
            _shift_kernel, shifts=self._shifts, c_tile=c_tile,
            H=H, W=W, n_cblocks=n_cblocks)

        # Lane-dense view: minor block dim is H*W (free reshape of contiguous NCHW).
        x_flat = x.reshape(N, C, HW)
        block = pl.BlockSpec((None, c_tile, HW), lambda n, j: (n, j, 0))

        # 2x (in + out) double-buffered blocks must fit the scoped VMEM limit;
        # 32 MiB covers the ~4 MiB block budget on v5e / v6e / v7x alike.
        vmem_limit = min(max(32 * 1024 * 1024, 4 * block_bytes + (4 << 20)),
                         96 * 1024 * 1024)

        y_flat = pl.pallas_call(
            kernel,
            grid=(N, n_cblocks),
            in_specs=[block],
            out_specs=block,
            out_shape=jax.ShapeDtypeStruct((N, C, HW), x.dtype),
            compiler_params=pltpu.CompilerParams(
                dimension_semantics=("parallel", "parallel"),
                vmem_limit_bytes=vmem_limit),
            cost_estimate=pl.CostEstimate(
                flops=0, transcendentals=0,
                bytes_accessed=2 * N * C * HW * itemsize),
        )(x_flat)
        return y_flat.reshape(N, C, H, W)


# --------------------------- pure-JAX reference ---------------------------

def _reference_shift(x, shift_t):
    N, C, H, W = x.shape
    outs = []
    for c in range(C):
        dx = int(shift_t[c, 0])
        dy = int(shift_t[c, 1])
        p = max(abs(dx), abs(dy), 1)
        xp = jnp.pad(x[:, c], ((0, 0), (p, p), (p, p)))
        outs.append(xp[:, p - dy:p - dy + H, p - dx:p - dx + W])
    return jnp.stack(outs, axis=1)


if __name__ == "__main__":
    key = jax.random.PRNGKey(0)
    kx, ks = jax.random.split(key)
    N, C, H, W = 2, 4, 16, 16
    x = jax.random.normal(kx, (N, C, H, W), dtype=jnp.float32)

    mod = ShiftPallas(C, kernel_size=3, key=ks)
    y = jax.block_until_ready(mod(x))

    ref = _reference_shift(x, mod.shift_t)
    assert y.shape == (N, C, H, W)
    assert jnp.array_equal(y, ref), "mismatch vs pure-JAX reference"
    print("KERNEL_OK")
</pallas_src>

<mosaic_0001>
module attributes {stable_mosaic.version = 11 : i64} {
  func.func @_shift_kernel(%arg0: i32, %arg1: i32, %arg2: memref<1x4x256xf32, #tpu.memory_space<vmem>>, %arg3: memref<1x4x256xf32, #tpu.memory_space<vmem>>) attributes {dimension_semantics = [#tpu.dimension_semantics<parallel>, #tpu.dimension_semantics<parallel>], iteration_bounds = array<i64: 2, 1>, scalar_prefetch = 0 : i64, scratch_operands = 0 : i64, tpu.core_type = #tpu.core_type<tc>, window_params = [{transform_indices = @transform_0, window_bounds = array<i64: 1, 4, 256>}, {transform_indices = @transform_1, window_bounds = array<i64: 1, 4, 256>}]} {
    %0 = tpu.iota {dimensions = array<i32: 1>} : vector<1x256xi32>
    %1 = arith.sitofp %0 : vector<1x256xi32> to vector<1x256xf32>
    %cst = arith.constant 5.000000e-01 : f32
    %2 = vector.broadcast %cst : f32 to vector<1x256xf32>
    %3 = arith.addf %1, %2 : vector<1x256xf32>
    %cst_0 = arith.constant 6.250000e-02 : f32
    %4 = vector.broadcast %cst_0 : f32 to vector<1x256xf32>
    %5 = arith.mulf %3, %4 : vector<1x256xf32>
    %6 = math.floor %5 : vector<1x256xf32>
    %7 = arith.fptosi %6 : vector<1x256xf32> to vector<1x256xi32>
    %c16_i32 = arith.constant 16 : i32
    %8 = vector.broadcast %c16_i32 : i32 to vector<1x256xi32>
    %9 = arith.muli %7, %8 : vector<1x256xi32>
    %10 = arith.subi %0, %9 : vector<1x256xi32>
    %c0 = arith.constant 0 : index
    %c0_1 = arith.constant 0 : index
    %c0_2 = arith.constant 0 : index
    %11 = vector.load %arg2[%c0, %c0_1, %c0_2] : memref<1x4x256xf32, #tpu.memory_space<vmem>>, vector<1x1x256xf32>
    %12 = vector.shape_cast %11 : vector<1x1x256xf32> to vector<1x256xf32>
    %13 = vector.extract_strided_slice %12 {offsets = [0, 239], sizes = [1, 17], strides = [1, 1]} : vector<1x256xf32> to vector<1x17xf32>
    %14 = vector.extract_strided_slice %12 {offsets = [0, 0], sizes = [1, 239], strides = [1, 1]} : vector<1x256xf32> to vector<1x239xf32>
    %15 = tpu.concatenate %13, %14 in 1 : vector<1x17xf32>, vector<1x239xf32> -> vector<1x256xf32>
    %c16_i32_3 = arith.constant 16 : i32
    %16 = vector.broadcast %c16_i32_3 : i32 to vector<1x256xi32>
    %17 = arith.cmpi sge, %0, %16 : vector<1x256xi32>
    %c272_i32 = arith.constant 272 : i32
    %18 = vector.broadcast %c272_i32 : i32 to vector<1x256xi32>
    %19 = arith.cmpi slt, %0, %18 : vector<1x256xi32>
    %20 = arith.andi %17, %19 : vector<1x256xi1>
    %c1_i32 = arith.constant 1 : i32
    %21 = vector.broadcast %c1_i32 : i32 to vector<1x256xi32>
    %22 = arith.cmpi sge, %10, %21 : vector<1x256xi32>
    %23 = arith.andi %20, %22 : vector<1x256xi1>
    %cst_4 = arith.constant 0.000000e+00 : f32
    %24 = vector.broadcast %cst_4 : f32 to vector<1x256xf32>
    %25 = arith.select %23, %15, %24 : vector<1x256xi1>, vector<1x256xf32>
    %c0_5 = arith.constant 0 : index
    %c0_6 = arith.constant 0 : index
    %c0_7 = arith.constant 0 : index
    %26 = vector.load %arg3[%c0_5, %c0_6, %c0_7] : memref<1x4x256xf32, #tpu.memory_space<vmem>>, vector<1x1x256xf32>
    %27 = vector.shape_cast %26 : vector<1x1x256xf32> to vector<1x256xf32>
    %28 = vector.shape_cast %25 : vector<1x256xf32> to vector<1x1x256xf32>
    tpu.vector_store %arg3[%c0_5, %c0_6, %c0_7], %28 {strides = array<i32>} : memref<1x4x256xf32, #tpu.memory_space<vmem>>, vector<1x1x256xf32>,
    %c0_8 = arith.constant 0 : index
    %c1 = arith.constant 1 : index
    %c0_9 = arith.constant 0 : index
    %29 = vector.load %arg2[%c0_8, %c1, %c0_9] : memref<1x4x256xf32, #tpu.memory_space<vmem>>, vector<1x1x256xf32>
    %30 = vector.shape_cast %29 : vector<1x1x256xf32> to vector<1x256xf32>
    %c0_10 = arith.constant 0 : index
    %c1_11 = arith.constant 1 : index
    %c0_12 = arith.constant 0 : index
    %31 = vector.load %arg3[%c0_10, %c1_11, %c0_12] : memref<1x4x256xf32, #tpu.memory_space<vmem>>, vector<1x1x256xf32>
    %32 = vector.shape_cast %31 : vector<1x1x256xf32> to vector<1x256xf32>
    %33 = vector.shape_cast %30 : vector<1x256xf32> to vector<1x1x256xf32>
    tpu.vector_store %arg3[%c0_10, %c1_11, %c0_12], %33 {strides = array<i32>} : memref<1x4x256xf32, #tpu.memory_space<vmem>>, vector<1x1x256xf32>,
    %c0_13 = arith.constant 0 : index
    %c2 = arith.constant 2 : index
    %c0_14 = arith.constant 0 : index
    %34 = vector.load %arg2[%c0_13, %c2, %c0_14] : memref<1x4x256xf32, #tpu.memory_space<vmem>>, vector<1x1x256xf32>
    %35 = vector.shape_cast %34 : vector<1x1x256xf32> to vector<1x256xf32>
    %36 = vector.extract_strided_slice %35 {offsets = [0, 239], sizes = [1, 17], strides = [1, 1]} : vector<1x256xf32> to vector<1x17xf32>
    %37 = vector.extract_strided_slice %35 {offsets = [0, 0], sizes = [1, 239], strides = [1, 1]} : vector<1x256xf32> to vector<1x239xf32>
    %38 = tpu.concatenate %36, %37 in 1 : vector<1x17xf32>, vector<1x239xf32> -> vector<1x256xf32>
    %cst_15 = arith.constant 0.000000e+00 : f32
    %39 = vector.broadcast %cst_15 : f32 to vector<1x256xf32>
    %40 = arith.select %23, %38, %39 : vector<1x256xi1>, vector<1x256xf32>
    %c0_16 = arith.constant 0 : index
    %c2_17 = arith.constant 2 : index
    %c0_18 = arith.constant 0 : index
    %41 = vector.load %arg3[%c0_16, %c2_17, %c0_18] : memref<1x4x256xf32, #tpu.memory_space<vmem>>, vector<1x1x256xf32>
    %42 = vector.shape_cast %41 : vector<1x1x256xf32> to vector<1x256xf32>
    %43 = vector.shape_cast %40 : vector<1x256xf32> to vector<1x1x256xf32>
    tpu.vector_store %arg3[%c0_16, %c2_17, %c0_18], %43 {strides = array<i32>} : memref<1x4x256xf32, #tpu.memory_space<vmem>>, vector<1x1x256xf32>,
    %c0_19 = arith.constant 0 : index
    %c3 = arith.constant 3 : index
    %c0_20 = arith.constant 0 : index
    %44 = vector.load %arg2[%c0_19, %c3, %c0_20] : memref<1x4x256xf32, #tpu.memory_space<vmem>>, vector<1x1x256xf32>
    %45 = vector.shape_cast %44 : vector<1x1x256xf32> to vector<1x256xf32>
    %46 = vector.extract_strided_slice %45 {offsets = [0, 255], sizes = [1, 1], strides = [1, 1]} : vector<1x256xf32> to vector<1x1xf32>
    %47 = vector.extract_strided_slice %45 {offsets = [0, 0], sizes = [1, 255], strides = [1, 1]} : vector<1x256xf32> to vector<1x255xf32>
    %48 = tpu.concatenate %46, %47 in 1 : vector<1x1xf32>, vector<1x255xf32> -> vector<1x256xf32>
    %c0_i32 = arith.constant 0 : i32
    %49 = vector.broadcast %c0_i32 : i32 to vector<1x256xi32>
    %50 = arith.cmpi sge, %0, %49 : vector<1x256xi32>
    %c256_i32 = arith.constant 256 : i32
    %51 = vector.broadcast %c256_i32 : i32 to vector<1x256xi32>
    %52 = arith.cmpi slt, %0, %51 : vector<1x256xi32>
    %53 = arith.andi %50, %52 : vector<1x256xi1>
    %c1_i32_21 = arith.constant 1 : i32
    %54 = vector.broadcast %c1_i32_21 : i32 to vector<1x256xi32>
    %55 = arith.cmpi sge, %10, %54 : vector<1x256xi32>
    %56 = arith.andi %53, %55 : vector<1x256xi1>
    %cst_22 = arith.constant 0.000000e+00 : f32
    %57 = vector.broadcast %cst_22 : f32 to vector<1x256xf32>
    %58 = arith.select %56, %48, %57 : vector<1x256xi1>, vector<1x256xf32>
    %c0_23 = arith.constant 0 : index
    %c3_24 = arith.constant 3 : index
    %c0_25 = arith.constant 0 : index
    %59 = vector.load %arg3[%c0_23, %c3_24, %c0_25] : memref<1x4x256xf32, #tpu.memory_space<vmem>>, vector<1x1x256xf32>
    %60 = vector.shape_cast %59 : vector<1x1x256xf32> to vector<1x256xf32>
    %61 = vector.shape_cast %58 : vector<1x256xf32> to vector<1x1x256xf32>
    tpu.vector_store %arg3[%c0_23, %c3_24, %c0_25], %61 {strides = array<i32>} : memref<1x4x256xf32, #tpu.memory_space<vmem>>, vector<1x1x256xf32>,
    return
  }
  func.func @transform_0(%arg0: i32, %arg1: i32) -> (i32, i32, i32) {
    %c0_i32 = arith.constant 0 : i32
    %c0_i32_0 = arith.constant 0 : i32
    return %arg0, %arg1, %c0_i32 : i32, i32, i32
  }
  func.func @transform_1(%arg0: i32, %arg1: i32) -> (i32, i32, i32) {
    %c0_i32 = arith.constant 0 : i32
    %c0_i32_0 = arith.constant 0 : i32
    return %arg0, %arg1, %c0_i32 : i32, i32, i32
  }
}

</mosaic_0001>

<bundles_post_ra>
// kernel: tpu_custom_call.1
= control target key start
LH: loop header
LB: loop body
LE: loop exit
PB: predicated region body
PF: predicated region fallthrough
CT: control target
= control target key end

     0   :  { %6 = vsyncpa [#allocation3], 0  ;;  %s853_s0 = inlined_call_operand.hbm [shape: f32[2,4,256], index: 0, kind: input, shape index: {}]   ;;  %s854_s1 = inlined_call_operand.hbm [shape: f32[2,4,256], index: 1, kind: output, shape index: {}]  }
   0x1   :  { %8 = vsyncpa [#allocation3 + $0x1], 0 }
   0x2   :  { %9 = vsyncpa [#allocation4], 0 }
   0x3   :  { %11 = vsyncpa [#allocation4 + $0x1], 0  ;;  %s642_s6 = smov 0   ;;  %s644_s7 = smov 0  }
   0x4   :  { %s646_s8 = smov 0   ;;  %s648_s9 = smov 0  }
   0x5   :  { %s650_s10 = smov 0   ;;  %s652_s11 = smov 0  }
   0x6 LB: > { %s421_s12 = sadd.s32 4294967295, %s625_s11   ;;  %s422_s13 = sadd.s32 4294967294, %s625_s11   ;;  %s625_s11 = sphi %s652_s11, %s17_s11   ;;  %s621_s10 = sphi %s650_s10, %s876_s10   ;;  %s617_s9 = sphi %s648_s9, %s875_s9   ;;  %s613_s8 = sphi %s646_s8, %s874_s8   ;;  %s609_s7 = sphi %s644_s7, %s873_s7   ;;  %s605_s6 = sphi %s642_s6, %s872_s6  }
   0x7   : > { %s29_s14 = sadd.s32 1, %s621_s10  ;;  %s38_s15 = sadd.s32 1, %s613_s8 }
   0x8   : > { %p31_p0 = scmp.ge.s32.totalorder %s29_s14, 2  ;;  %p45_p1 = scmp.ne.s32.totalorder %s613_s8, %s609_s7 }
   0x9   : > { %p46_p2 = scmp.eq.s32.totalorder %s625_s11, 0  ;;  %p51_p3 = scmp.ne.s32.totalorder %s609_s7, %s605_s6 }
   0xa   : > { %s878_s14 = smov (%p31_p0, %s29_s14), 0  ;;  %p52_p5 = scmp.eq.s32.totalorder %s421_s12, 0 }
   0xb   : > { %p683_p4 = por %p46_p2, %p45_p1  ;;  %s33_s17 = ssub.s32 %s621_s10, %s878_s14 }
   0xc   : > { %p77_p6 = scmp.eq.s32.totalorder %s421_s12, 1  ;;  %p36_p7 = scmp.eq.s32.totalorder %s33_s17, 0 }
   0xd   : > { %p689_p8 = por %p52_p5, %p51_p3  ;;  %p83_p10 = scmp.eq.s32.totalorder %s422_s13, 1 }
   0xe   : > { %p693_p9 = por %p77_p6, %p45_p1  ;;  %p460_p13 = scmp.lt.s32.totalorder %s625_s11, 2 }
   0xf   : > { %s698_s20 = scalar_select %p36_p7, %s613_s8, %s38_s15  }
  0x10   : > { %s858_s19 = scalar_select %p693_p9, 1, 0 }
  0x11   : > { %p700_p11 = por %p83_p10, %p51_p3  ;;  %s103_s22 = sand.u32 1, %s613_s8  }
  0x12   : > { %s425_s23 = sshll.u32 %s103_s22, 3  ;;  %s442_s24 = sshll.u32 %s621_s10, 7 }
  0x13   : > { %s859_s21 = scalar_select %p700_p11, 1, 0 }
  0x14   : > { %s711_s27 = scalar_lea.hbm %s853_s0, %s442_s24  ;;  %s107_s28 = scalar_lea.vmem [#allocation2], %s425_s23 }
  0x15   : > { %s117_s29 = sshll.u32 %s107_s28, 4  ;;  %p717_p0 = pnand %p460_p13, %p683_p4  ;;  %s713_s29 = int_to_ptr.vmem [resolvable:$true] %s117_s29 }
  0x16   : > { %s104_s2 = scalar_lea.sflag [#allocation3], %s103_s22  ;;  %s513_s3 = scalar_lea.hbm %s711_s27, 128 }
  0x17   : > { %p514_p3 = scmp.ne.s32.totalorder %s711_s27, %s513_s3  ;;  %p515_p5 = pneg %p717_p0 }
  0x18   : > { %s518_s12 = scalar_lea.hbm %s853_s0, 256  ;;  %p519_p4 = scmp.lt.u32.totalorder %s711_s27, %s853_s0 }
  0x19   : > { %p516_p6 = pnand %p515_p5, %p514_p3  ;;  %p520_p10 = scmp.lt.u32.totalorder %s518_s12, %s513_s3 }
  0x1a   : > { %p522_p12 = scmp.lt.u32.totalorder %s513_s3, %s711_s27 }
  0x1b   : > { %p517_p7 = pneg %p516_p6  ;;  %p521_p13 = por %p520_p10, %p519_p4 }
  0x1d   : > { %p523_p1 = por %p522_p12, %p521_p13 }
  0x1f   : > { %p524_p2 = pnand %p523_p1, %p517_p7 }
  0x21   : > { %527 = shalt.err (!%p524_p2)
}
  0x22   : > { %s528_s16 = scalar_lea.vmem %s713_s29, 128  ;;  %s627_s17 = smov [#allocation2]  }
  0x23   : > { %p529_p3 = scmp.ne.s32.totalorder %s713_s29, %s528_s16  ;;  %s533_s22 = sshll.u32 %s627_s17, 4  ;;  %s534_s22 = int_to_ptr.vmem [resolvable:$false] %s533_s22 }
  0x24   : > { %s535_s23 = scalar_lea.vmem %s534_s22, 256  ;;  %p536_p9 = scmp.lt.s32.totalorder %s713_s29, %s534_s22 }
  0x25   : > { %p531_p6 = pnand %p529_p3, %p515_p5  ;;  %p537_p4 = scmp.lt.s32.totalorder %s535_s23, %s528_s16 }
  0x27   : > { %p532_p11 = pneg %p531_p6  ;;  %p538_p10 = por %p537_p4, %p536_p9 }
  0x29   : > { %p539_p12 = pnand %p538_p10, %p532_p11 }
  0x2b   : > { %542 = shalt.err (!%p539_p12)
}
  0x2c   : > { %455 = dma.hbm_to_vmem [thread:$0]  (!%p717_p0), %s711_s27, 128, %s713_s29, %s104_s2  }
  0x2d   : > { %p861_p1 = scmp.lt.s32.totalorder %s625_s11, 3  ;;  %p862_p2 = scmp.ge.s32.totalorder %s625_s11, 1 }
  0x2f   : > { %p123_p5 = pnand %p862_p2, %p861_p1 }
  0x30   : > { %s753_s24 = sand.u32 (!%p123_p5), 1, %s609_s7  }
  0x31   : > { %126 = sbr.rel (%p123_p5) target bundleno = 210 (0xd2), region = 24  ;;  %s429_s25 = sshll.u32 (!%p123_p5), %s753_s24, 3 }
  0x32   : > { %s129_s26 = scalar_lea.sflag (!%p123_p5), [#allocation3], %s753_s24  ;;  %s132_s28 = scalar_lea.vmem (!%p123_p5), [#allocation2], %s429_s25 }
  0x38   : > { %596 = dma.done.wait (%p689_p8), %s129_s26, 128  }
  0x39   : > { %598 = vsyncadd (%p689_p8), %s129_s26, 4294967168  ;;  %v151_v0 = vlaneseq  ;;  %v433_v4 = vld [vmem:[%s132_s28 + $0x2] ss:$4 sm:$0x3]  ;;  %s628_s27 = smov 17   ;;  %s765_s18 = scalar_lea.vmem [#allocation5], %s429_s25 }
  0x3a   : > { %v168_v5 = vld [vmem:[%s132_s28] ss:$4 sm:$0x3]  ;;  %v435_v10 = vld [vmem:[%s132_s28 + $0x3] ss:$4 sm:$0x3] }
  0x3b   : > { %v171_v1 = vshrl.u32 %v151_v0, 7  ;;  %vm761_vm0 = vcmp.lt.s32.totalorder %v151_v0, 256  ;;  %v431_v12 = vld [vmem:[%s132_s28 + $0x1] ss:$4 sm:$0x3]  ;;  %s629_s29 = smov 1  }
  0x3c   : > { %432 = vst.msk [vmem:[%s765_s18 + $0x1] ss:$4 sm:$0x3] %vm761_vm0, %v431_v12  ;;  %v152_v15 = vand.u32 127, %v151_v0  ;;  %v630_v31 = vmov 1966171168  }
  0x3d   : > { %v172_v2 = vsub.s32 1, %v171_v1  ;;  %v179_v3 = vsub.s32 0, %v171_v1  ;;  %v204_v32 = vunpack.c.l.s4 %v630_v31  ;;  %vm183_vm3 = vcmask 138240   ;;  %s443_s30 = sshll.u32 %s617_s9, 7  ;;  %s337_s2 = sshll.u32 %s765_s18, 4  ;;  %s803_s2 = int_to_ptr.vmem [resolvable:$true] %s337_s2 }
  0x3e   : > { %v153_v16 = vadd.s32 128, %v152_v15  ;;  %v154_v17 = vcvt.s32.f32 %v152_v15  ;;  %vm188_vm1 = vcmp.ge.s32.totalorder %v152_v15, 16  ;;  %vm285_vm6 = vcmask 7168   ;;  %s801_s5 = scalar_lea.hbm %s854_s1, %s443_s30  ;;  %s321_s9 = scalar_lea.sflag [#allocation4], %s753_s24 }
  0x3f   : > { %v233_v6 = vrot.slane %v433_v4, %v172_v2  ;;  %v173_v7 = vrot.slane %v168_v5, %v172_v2  ;;  %v240_v8 = vrot.slane %v433_v4, %v179_v3  ;;  %v180_v9 = vrot.slane %v168_v5, %v179_v3  ;;  %s543_s12 = scalar_lea.vmem %s803_s2, 128  ;;  %p869_p9 = scmp.ne.s32.totalorder %s858_s19, 0 }
  0x40   : > { %v282_v13 = vrot.slane %v435_v10, %v179_v3  ;;  %v275_v14 = vrot.slane %v435_v10, %v172_v2  ;;  %v155_v18 = vcvt.s32.f32 %v153_v16  ;;  %v156_v19 = vadd.f32 0.5, %v154_v17  ;;  %p544_p8 = scmp.ne.s32.totalorder %s803_s2, %s543_s12  ;;  %s631_s13 = smov [#allocation5]  }
  0x41   : > { %234 = vrot.lane.b32.xlu1 %v233_v6, %s628_s27  ;;  %174 = vrot.lane.b32.xlu0 %v173_v7, %s628_s27  ;;  %v205_v35 = vunpack.c.0.s8 %v204_v32  ;;  %s547_s15 = sshll.u32 %s631_s13, 4  ;;  %s548_s15 = int_to_ptr.vmem [resolvable:$false] %s547_s15 }
  0x42   : > { %v157_v20 = vadd.f32 0.5, %v155_v18  ;;  %v158_v21 = vmul.f32 0.0625, %v156_v19  ;;  %p545_p11 = pnand %p544_p8, %p869_p9  ;;  %s549_s16 = scalar_lea.vmem %s548_s15, 256 }
  0x43   : > { %v208_v40 = vsub.s32 %v205_v35, %v171_v1  ;;  %p550_p7 = scmp.lt.s32.totalorder %s803_s2, %s548_s15  ;;  %p551_p13 = scmp.lt.s32.totalorder %s549_s16, %s543_s12 }
  0x44   : > { %v159_v22 = vmul.f32 0.0625, %v157_v20  ;;  %v160_v23 = vfloor.f32 %v158_v21  ;;  %p546_p0 = pneg %p545_p11 }
  0x45   : > { %241 = vrot.lane.b32.xlu1 %v240_v8, %s628_s27  ;;  %181 = vrot.lane.b32.xlu0 %v180_v9, %s628_s27  ;;  %p552_p3 = por %p551_p13, %p550_p7 }
  0x46   : > { %v161_v24 = vfloor.f32 %v159_v22  ;;  %v444_v25 = vtrunc.f32 %v160_v23 }
  0x47   : > { %p553_p6 = pnand %p552_p3, %p546_p0 }
  0x48   : > { %v446_v26 = vtrunc.f32 %v161_v24  ;;  %v445_v27 = vcvt.f32.s32 %v444_v25 }
  0x49   : > { %283 = vrot.lane.b32.xlu1 %v282_v13, %s629_s29  ;;  %276 = vrot.lane.b32.xlu0 %v275_v14, %s629_s29 }
  0x4a   : > { %v447_v28 = vcvt.f32.s32 %v446_v26  ;;  %v164_v29 = vmul.u32 16, %v445_v27 }
  0x4c   : > { %v165_v30 = vmul.u32 16, %v447_v28  ;;  %v166_v33 = vsub.s32 %v152_v15, %v164_v29 }
  0x4e   : > { %v167_v34 = vsub.s32 %v153_v16, %v165_v30  ;;  %vm770_vm2 = vcmp.ge.s32.totalorder %v166_v33, 1 }
  0x4f   : > { %vm196_vm5 = vmand %vm188_vm1, %vm770_vm2 }
  0x50   : > { %vm774_vm4 = vcmp.ge.s32.totalorder %v167_v34, 1 }
  0xb3   : > { %v235_v36 = vpop.permute.xlu1 %234  ;;  %v175_v37 = vpop.permute.xlu0 %174 }
  0xb7   : > { %v242_v41 = vpop.permute.xlu1 %241  ;;  %v182_v42 = vpop.permute.xlu0 %181 }
  0xb8   : > { %v243_v43 = vsel %vm183_vm3, %v242_v41, %v235_v36  ;;  %v246_v44 = vsel %vm183_vm3, %v235_v36, %v242_v41  ;;  %v184_v45 = vsel %vm183_vm3, %v182_v42, %v175_v37  ;;  %v187_v46 = vsel %vm183_vm3, %v175_v37, %v182_v42 }
  0xb9   : > { %v247_v47 = vsel %vm196_vm5, %v246_v44, 0.0  ;;  %v248_v48 = vsel %vm774_vm4, %v243_v43, 0.0  ;;  %v198_v49 = vsel %vm196_vm5, %v187_v46, 0.0  ;;  %v199_v50 = vsel %vm774_vm4, %v184_v45, 0.0 }
  0xba   : > { %v251_v51 = vcombine.low %v247_v47, %v248_v48  ;;  %v202_v52 = vcombine.low %v198_v49, %v199_v50 }
  0xbb   : > { %v284_v53 = vpop.permute.xlu1 %283  ;;  %v277_v54 = vpop.permute.xlu0 %276 }
  0xbc   : > { %v258_v55 = vrot.slane %v251_v51, %v208_v40  ;;  %v209_v56 = vrot.slane %v202_v52, %v208_v40  ;;  %v286_v57 = vsel %vm285_vm6, %v284_v53, %v277_v54  ;;  %v289_v58 = vsel %vm285_vm6, %v277_v54, %v284_v53 }
  0xbd   : > { %v298_v59 = vsel %vm770_vm2, %v289_v58, 0.0  ;;  %v299_v60 = vsel %vm774_vm4, %v286_v57, 0.0 }
  0xbe   : > { %v265_v61 = vrot.slane %v258_v55, %v208_v40  ;;  %v216_v62 = vrot.slane %v209_v56, %v208_v40  ;;  %v302_v63 = vcombine.low %v298_v59, %v299_v60 }
  0xc0   : > { %v309_v0 = vrot.slane %v302_v63, %v208_v40  ;;  %222 = vst.msk [vmem:[%s765_s18] ss:$4 sm:$0x3] %vm761_vm0, %v216_v62  ;;  %434 = vst.msk [vmem:[%s765_s18 + $0x2] ss:$4 sm:$0x3] %vm761_vm0, %v265_v61 }
  0xc2   : > { %v316_v1 = vrot.slane %v309_v0, %v208_v40 }
  0xc4   : > { %436 = vst.msk [vmem:[%s765_s18 + $0x3] ss:$4 sm:$0x3] %vm761_vm0, %v316_v1 }
  0xc5   : > { %556 = shalt.err (!%p553_p6)
}
  0xc6   : > { %s557_s17 = scalar_lea.hbm %s801_s5, 128  ;;  %s561_s24 = scalar_lea.hbm %s854_s1, 256 }
  0xc7   : > { %p558_p4 = scmp.ne.s32.totalorder %s801_s5, %s557_s17  ;;  %p562_p1 = scmp.lt.u32.totalorder %s801_s5, %s854_s1 }
  0xc8   : > { %p563_p2 = scmp.lt.u32.totalorder %s561_s24, %s557_s17  ;;  %p565_p8 = scmp.lt.u32.totalorder %s557_s17, %s801_s5 }
  0xc9   : > { %p559_p10 = pnand %p558_p4, %p869_p9 }
  0xca   : > { %p564_p5 = por %p563_p2, %p562_p1 }
  0xcb   : > { %p560_p12 = pneg %p559_p10 }
  0xcc   : > { %p566_p11 = por %p565_p8, %p564_p5 }
  0xce   : > { %p567_p0 = pnand %p566_p11, %p560_p12 }
  0xd0   : > { %570 = shalt.err (!%p567_p0)
}
  0xd1   : > { %450 = dma.vmem_to_hbm [thread:$0]  (%p869_p9), %s803_s2, 128, %s801_s5, %s321_s9  }
  0xd2 PF: > { %s349_s28 = sand.u32 1, %s605_s6   ;;  %p870_p7 = scmp.ne.s32.totalorder %s859_s21, 0 }
  0xd3   : > { %p871_p13 = scmp.ge.s32.totalorder %s625_s11, 2  ;;  %s350_s27 = scalar_lea.sflag [#allocation4], %s349_s28 }
  0xd5   : > { %p457_p3 = pnand %p871_p13, %p870_p7 }
  0xd7   : > { %600 = dma.done.wait (!%p457_p3), %s350_s27, 128  }
  0xd8   : > { %602 = vsyncadd (!%p457_p3), %s350_s27, 4294967168  ;;  %s17_s11 = sadd.s32 1, %s625_s11   ;;  %s872_s6 = smov %s609_s7 }
  0xd9   : > { %p14_p6 = scmp.ge.s32.totalorder %s17_s11, 4   ;;  %s873_s7 = smov %s613_s8 }
  0xda   : > { %s874_s8 = smov %s698_s20  ;;  %s875_s9 = smov %s621_s10 }
  0xdb   : > { %s876_s10 = smov %s878_s14  ;;  %16 = sbr.rel (!%p14_p6) target bundleno = 6 (0x6), region = 75 }
  0xe2   :  { %355 = vsyncpa [#allocation3], 1 }
  0xe3   :  { %357 = vsyncpa [#allocation3 + $0x1], 1 }
  0xe4   :  { %358 = vsyncpa [#allocation4], 1 }
  0xe5   :  { %360 = vsyncpa [#allocation4 + $0x1], 1 }

</bundles_post_ra>
